<compile_context>
chip_gen: v5e
topology: v5e:2x2
jax: 0.10.0
libtpu: 0.0.40
codegen_flags: <defaults>
</compile_context>

<pallas_src>
import jax
import jax.numpy as jnp
from jax import lax
from jax.experimental import pallas as pl
from jax.experimental.pallas import tpu as pltpu

GN_EPS = 1e-5  # torch.nn.GroupNorm default


def _shuffle_attn_kernel(x_ref, c_ref, out_ref):
    """Fused per-channel gating + channel_shuffle(groups=2).

    x_ref   : (Tb, 2, CBH, HW)  the two pre-shuffle channel halves of the block
    c_ref   : (3, 2, CBH, 1)    rows = [alpha, beta, gamma], per half / channel
    out_ref : (Tb, CBH, 2*HW)   shuffled output: lanes [0,HW) <- half 0 (even
                                out channels), lanes [HW,2HW) <- half 1 (odd)
    """
    hw = x_ref.shape[-1]

    def gated(side):
        x = x_ref[:, side].astype(jnp.float32)            # (Tb, CBH, HW)
        alpha = c_ref[0, side]                             # (CBH, 1)
        beta = c_ref[1, side]
        gamma = c_ref[2, side]
        # Per-channel stats over the spatial (lane) axis, in f32.
        mean = jnp.mean(x, axis=-1, keepdims=True)         # (Tb, CBH, 1)
        var = jnp.mean(jnp.square(x - mean), axis=-1, keepdims=True)
        # gate = sigmoid(alpha*xn + beta*mean + gamma) == sigmoid(A*x + B)
        a = alpha * lax.rsqrt(var + GN_EPS)                # (Tb, CBH, 1)
        bias = (beta - a) * mean + gamma                   # (Tb, CBH, 1)
        return (x * jax.nn.sigmoid(a * x + bias)).astype(out_ref.dtype)

    out_ref[:, :, 0:hw] = gated(0)
    out_ref[:, :, hw:2 * hw] = gated(1)


def _vmem_capacity_bytes():
    try:
        return int(pltpu.get_tpu_info().vmem_capacity_bytes)
    except Exception:
        return 64 * 1024 * 1024  # conservative (v7x-sized)


def _choose_tiles(b, half, hw, itemsize, cap_bytes):
    """Pick (batch tile Tb, per-half channel tile CBH)."""
    bytes_per_sample = 2 * half * hw * itemsize
    if bytes_per_sample <= cap_bytes:
        cbh = half                                   # full channel extent
        tb = max(1, min(b, cap_bytes // bytes_per_sample))
    else:
        tb = 1
        cbh = half
        if half % 8 == 0:                            # (8, 128) sublane rule
            per_pair = 2 * hw * itemsize             # bytes per channel pair
            budget = max(8, cap_bytes // per_pair)
            best = 8
            for d in range(8, half + 1, 8):
                if half % d == 0 and d <= budget:
                    best = d
            cbh = best
        # TODO(synk): huge single-channel spatial maps (one channel pair
        # exceeding the cap) would need an HW split with a two-pass reduction.
    # Keep the grid >= 2 steps so megacore (v7x: 2 TensorCores) can split it.
    if ((b + tb - 1) // tb) * (half // cbh) < 2:
        if b >= 2:
            tb = (b + 1) // 2
        elif half % 16 == 0:
            cbh = half // 2
    return tb, cbh


def shuffle_attention(x, params, *, G=8):
    """x: (B, C, H, W) NCHW like the PyTorch module.
    params: (6, C//(2G)) rows [cweight, cbias, sweight, sbias, gn_w, gn_b]."""
    b, c, h, w = x.shape
    assert c % (2 * G) == 0, "channel must be divisible by 2*G"
    half = c // 2
    hw = h * w

    cw, cb_, sw, sb, gw, gnb = [params[i].astype(jnp.float32) for i in range(6)]
    # Unified gate: sigmoid(alpha*xn + beta*mean + gamma)
    #   channel branch: alpha=0,        beta=cweight, gamma=cbias
    #   spatial branch: alpha=sw*gn_w,  beta=0,       gamma=sw*gn_b + sbias
    alpha_g = jnp.concatenate([jnp.zeros_like(sw), sw * gw])     # (2*C',)
    beta_g = jnp.concatenate([cw, jnp.zeros_like(cw)])
    gamma_g = jnp.concatenate([cb_, sw * gnb + sb])
    coeffs = jnp.stack([jnp.tile(alpha_g, G),
                        jnp.tile(beta_g, G),
                        jnp.tile(gamma_g, G)])                    # (3, C)
    coeffs = coeffs.reshape(3, 2, half, 1)                        # split halves

    # Free contiguous view: channels [0, C/2) and [C/2, C) as two halves.
    x4 = x.reshape(b, 2, half, hw)

    itemsize = jnp.dtype(x.dtype).itemsize
    if _vmem_capacity_bytes() >= 128 * 1024 * 1024:               # v5e / v6e
        cap_bytes, vmem_limit = 8 * 1024 * 1024, 64 * 1024 * 1024
    else:                                                         # v7x (64 MiB)
        cap_bytes, vmem_limit = 4 * 1024 * 1024, 40 * 1024 * 1024

    tb, cbh = _choose_tiles(b, half, hw, itemsize, cap_bytes)
    grid = (pl.cdiv(b, tb), half // cbh)

    # TODO(synk): if H*W is not a multiple of 128 (e.g. 14x14 maps), lanes are
    # padded/masked per vreg; restructuring to channels-on-lanes would help.
    cost = pl.CostEstimate(
        flops=10 * b * c * hw,
        transcendentals=b * c * hw,
        bytes_accessed=2 * b * c * hw * itemsize,
    )

    out = pl.pallas_call(
        _shuffle_attn_kernel,
        out_shape=jax.ShapeDtypeStruct((b, half, 2 * hw), x.dtype),
        grid_spec=pltpu.PrefetchScalarGridSpec(
            num_scalar_prefetch=0,
            grid=grid,
            in_specs=[
                pl.BlockSpec((tb, 2, cbh, hw), lambda i, j: (i, 0, j, 0)),
                pl.BlockSpec((3, 2, cbh, 1), lambda i, j: (0, 0, j, 0)),
            ],
            out_specs=pl.BlockSpec((tb, cbh, 2 * hw), lambda i, j: (i, j, 0)),
        ),
        compiler_params=pltpu.CompilerParams(
            dimension_semantics=("parallel", "parallel"),
            vmem_limit_bytes=vmem_limit,
        ),
        cost_estimate=cost,
    )(x4, coeffs)

    # (B, C/2, 2*HW) contiguous IS channel_shuffle(out, 2) — free reshape.
    return out.reshape(b, c, h, w)


def shuffle_attention_ref(x, params, *, G=8):
    """Pure-JAX reference mirroring the PyTorch forward exactly."""
    b, c, h, w = x.shape
    cw, cb_, sw, sb, gw, gnb = [params[i][None, :, None, None] for i in range(6)]

    xg = x.reshape(b * G, c // G, h, w)
    x0, x1 = jnp.split(xg, 2, axis=1)

    xc = jnp.mean(x0, axis=(2, 3), keepdims=True)
    xc = cw * xc + cb_
    x_channel = x0 * jax.nn.sigmoid(xc)

    m = jnp.mean(x1, axis=(2, 3), keepdims=True)
    v = jnp.mean((x1 - m) ** 2, axis=(2, 3), keepdims=True)
    xn = (x1 - m) / jnp.sqrt(v + GN_EPS)
    xn = xn * gw + gnb
    xs = sw * xn + sb
    x_spatial = x1 * jax.nn.sigmoid(xs)

    out = jnp.concatenate([x_channel, x_spatial], axis=1).reshape(b, c, h, w)
    out = out.reshape(b, 2, c // 2, h, w).transpose(0, 2, 1, 3, 4).reshape(b, c, h, w)
    return out


if __name__ == "__main__":
    # Small shapes consistent with the module: channel divisible by 2*G.
    B, C, H, W = 2, 64, 16, 16
    G = 8
    CP = C // (2 * G)

    key = jax.random.PRNGKey(0)
    kx, kp = jax.random.split(key)
    x = jax.random.normal(kx, (B, C, H, W), dtype=jnp.float32)

    # Module __init__: cweight=0, cbias=1, sweight=0, sbias=1, gn.w=1, gn.b=0.
    # Perturb so every code path is exercised.
    init = jnp.stack([
        jnp.zeros((CP,), jnp.float32),  # cweight
        jnp.ones((CP,), jnp.float32),   # cbias
        jnp.zeros((CP,), jnp.float32),  # sweight
        jnp.ones((CP,), jnp.float32),   # sbias
        jnp.ones((CP,), jnp.float32),   # gn weight
        jnp.zeros((CP,), jnp.float32),  # gn bias
    ])
    params = init + 0.1 * jax.random.normal(kp, (6, CP), dtype=jnp.float32)

    out = jax.block_until_ready(shuffle_attention(x, params, G=G))
    ref = jax.block_until_ready(shuffle_attention_ref(x, params, G=G))

    assert out.shape == (B, C, H, W)
    assert jnp.max(jnp.abs(out - ref)) < 1e-4, "mismatch vs reference"
    print("KERNEL_OK")
</pallas_src>

<mosaic_0001>
module attributes {stable_mosaic.version = 11 : i64} {
  func.func @_shuffle_attn_kernel(%arg0: i32, %arg1: i32, %arg2: memref<1x2x32x256xf32, #tpu.memory_space<vmem>>, %arg3: memref<3x2x32x1xf32, #tpu.memory_space<vmem>>, %arg4: memref<1x32x512xf32, #tpu.memory_space<vmem>>) attributes {dimension_semantics = [#tpu.dimension_semantics<parallel>, #tpu.dimension_semantics<parallel>], iteration_bounds = array<i64: 2, 1>, scalar_prefetch = 0 : i64, scratch_operands = 0 : i64, tpu.core_type = #tpu.core_type<tc>, window_params = [{transform_indices = @transform_0, window_bounds = array<i64: 1, 2, 32, 256>}, {transform_indices = @transform_1, window_bounds = array<i64: 3, 2, 32, 1>}, {transform_indices = @transform_2, window_bounds = array<i64: 1, 32, 512>}]} {
    %c0 = arith.constant 0 : index
    %c0_0 = arith.constant 0 : index
    %c0_1 = arith.constant 0 : index
    %c0_2 = arith.constant 0 : index
    %0 = vector.load %arg2[%c0, %c0_0, %c0_1, %c0_2] : memref<1x2x32x256xf32, #tpu.memory_space<vmem>>, vector<1x1x32x256xf32>
    %1 = vector.shape_cast %0 : vector<1x1x32x256xf32> to vector<1x32x256xf32>
    %c0_3 = arith.constant 0 : index
    %c0_4 = arith.constant 0 : index
    %c0_5 = arith.constant 0 : index
    %c0_6 = arith.constant 0 : index
    %2 = vector.load %arg3[%c0_3, %c0_4, %c0_5, %c0_6] : memref<3x2x32x1xf32, #tpu.memory_space<vmem>>, vector<1x1x32x1xf32>
    %3 = vector.shape_cast %2 : vector<1x1x32x1xf32> to vector<32x1xf32>
    %c1 = arith.constant 1 : index
    %c0_7 = arith.constant 0 : index
    %c0_8 = arith.constant 0 : index
    %c0_9 = arith.constant 0 : index
    %4 = vector.load %arg3[%c1, %c0_7, %c0_8, %c0_9] : memref<3x2x32x1xf32, #tpu.memory_space<vmem>>, vector<1x1x32x1xf32>
    %5 = vector.shape_cast %4 : vector<1x1x32x1xf32> to vector<32x1xf32>
    %c2 = arith.constant 2 : index
    %c0_10 = arith.constant 0 : index
    %c0_11 = arith.constant 0 : index
    %c0_12 = arith.constant 0 : index
    %6 = vector.load %arg3[%c2, %c0_10, %c0_11, %c0_12] : memref<3x2x32x1xf32, #tpu.memory_space<vmem>>, vector<1x1x32x1xf32>
    %7 = vector.shape_cast %6 : vector<1x1x32x1xf32> to vector<32x1xf32>
    %cst = arith.constant dense<0.000000e+00> : vector<1x32xf32>
    %8 = vector.multi_reduction <add>, %1, %cst [2] : vector<1x32x256xf32> to vector<1x32xf32>
    %9 = vector.shape_cast %8 : vector<1x32xf32> to vector<1x32x1xf32>
    %cst_13 = arith.constant 2.560000e+02 : f32
    %10 = vector.broadcast %cst_13 : f32 to vector<1x32x1xf32>
    %11 = arith.divf %9, %10 : vector<1x32x1xf32>
    %12 = vector.broadcast %11 : vector<1x32x1xf32> to vector<1x32x256xf32>
    %13 = arith.subf %1, %12 : vector<1x32x256xf32>
    %14 = arith.mulf %13, %13 : vector<1x32x256xf32>
    %cst_14 = arith.constant dense<0.000000e+00> : vector<1x32xf32>
    %15 = vector.multi_reduction <add>, %14, %cst_14 [2] : vector<1x32x256xf32> to vector<1x32xf32>
    %16 = vector.shape_cast %15 : vector<1x32xf32> to vector<1x32x1xf32>
    %cst_15 = arith.constant 2.560000e+02 : f32
    %17 = vector.broadcast %cst_15 : f32 to vector<1x32x1xf32>
    %18 = arith.divf %16, %17 : vector<1x32x1xf32>
    %cst_16 = arith.constant 9.99999974E-6 : f32
    %19 = vector.broadcast %cst_16 : f32 to vector<1x32x1xf32>
    %20 = arith.addf %18, %19 : vector<1x32x1xf32>
    %21 = math.rsqrt %20 : vector<1x32x1xf32>
    %22 = vector.shape_cast %3 : vector<32x1xf32> to vector<1x32x1xf32>
    %23 = arith.mulf %22, %21 : vector<1x32x1xf32>
    %24 = vector.shape_cast %5 : vector<32x1xf32> to vector<1x32x1xf32>
    %25 = arith.subf %24, %23 : vector<1x32x1xf32>
    %26 = arith.mulf %25, %11 : vector<1x32x1xf32>
    %27 = vector.shape_cast %7 : vector<32x1xf32> to vector<1x32x1xf32>
    %28 = arith.addf %26, %27 : vector<1x32x1xf32>
    %29 = vector.broadcast %23 : vector<1x32x1xf32> to vector<1x32x256xf32>
    %30 = arith.mulf %29, %1 : vector<1x32x256xf32>
    %31 = vector.broadcast %28 : vector<1x32x1xf32> to vector<1x32x256xf32>
    %32 = arith.addf %30, %31 : vector<1x32x256xf32>
    %33 = arith.negf %32 : vector<1x32x256xf32>
    %34 = math.exp %33 : vector<1x32x256xf32>
    %cst_17 = arith.constant 1.000000e+00 : f32
    %35 = vector.broadcast %cst_17 : f32 to vector<1x32x256xf32>
    %36 = arith.addf %35, %34 : vector<1x32x256xf32>
    %37 = arith.divf %35, %36 : vector<1x32x256xf32>
    %38 = arith.mulf %1, %37 : vector<1x32x256xf32>
    %c0_18 = arith.constant 0 : index
    %c0_19 = arith.constant 0 : index
    %c0_20 = arith.constant 0 : index
    %39 = vector.load %arg4[%c0_18, %c0_19, %c0_20] : memref<1x32x512xf32, #tpu.memory_space<vmem>>, vector<1x32x256xf32>
    tpu.vector_store %arg4[%c0_18, %c0_19, %c0_20], %38 {strides = array<i32>} : memref<1x32x512xf32, #tpu.memory_space<vmem>>, vector<1x32x256xf32>,
    %c0_21 = arith.constant 0 : index
    %c1_22 = arith.constant 1 : index
    %c0_23 = arith.constant 0 : index
    %c0_24 = arith.constant 0 : index
    %40 = vector.load %arg2[%c0_21, %c1_22, %c0_23, %c0_24] : memref<1x2x32x256xf32, #tpu.memory_space<vmem>>, vector<1x1x32x256xf32>
    %41 = vector.shape_cast %40 : vector<1x1x32x256xf32> to vector<1x32x256xf32>
    %c0_25 = arith.constant 0 : index
    %c1_26 = arith.constant 1 : index
    %c0_27 = arith.constant 0 : index
    %c0_28 = arith.constant 0 : index
    %42 = vector.load %arg3[%c0_25, %c1_26, %c0_27, %c0_28] : memref<3x2x32x1xf32, #tpu.memory_space<vmem>>, vector<1x1x32x1xf32>
    %43 = vector.shape_cast %42 : vector<1x1x32x1xf32> to vector<32x1xf32>
    %c1_29 = arith.constant 1 : index
    %c1_30 = arith.constant 1 : index
    %c0_31 = arith.constant 0 : index
    %c0_32 = arith.constant 0 : index
    %44 = vector.load %arg3[%c1_29, %c1_30, %c0_31, %c0_32] : memref<3x2x32x1xf32, #tpu.memory_space<vmem>>, vector<1x1x32x1xf32>
    %45 = vector.shape_cast %44 : vector<1x1x32x1xf32> to vector<32x1xf32>
    %c2_33 = arith.constant 2 : index
    %c1_34 = arith.constant 1 : index
    %c0_35 = arith.constant 0 : index
    %c0_36 = arith.constant 0 : index
    %46 = vector.load %arg3[%c2_33, %c1_34, %c0_35, %c0_36] : memref<3x2x32x1xf32, #tpu.memory_space<vmem>>, vector<1x1x32x1xf32>
    %47 = vector.shape_cast %46 : vector<1x1x32x1xf32> to vector<32x1xf32>
    %cst_37 = arith.constant dense<0.000000e+00> : vector<1x32xf32>
    %48 = vector.multi_reduction <add>, %41, %cst_37 [2] : vector<1x32x256xf32> to vector<1x32xf32>
    %49 = vector.shape_cast %48 : vector<1x32xf32> to vector<1x32x1xf32>
    %cst_38 = arith.constant 2.560000e+02 : f32
    %50 = vector.broadcast %cst_38 : f32 to vector<1x32x1xf32>
    %51 = arith.divf %49, %50 : vector<1x32x1xf32>
    %52 = vector.broadcast %51 : vector<1x32x1xf32> to vector<1x32x256xf32>
    %53 = arith.subf %41, %52 : vector<1x32x256xf32>
    %54 = arith.mulf %53, %53 : vector<1x32x256xf32>
    %cst_39 = arith.constant dense<0.000000e+00> : vector<1x32xf32>
    %55 = vector.multi_reduction <add>, %54, %cst_39 [2] : vector<1x32x256xf32> to vector<1x32xf32>
    %56 = vector.shape_cast %55 : vector<1x32xf32> to vector<1x32x1xf32>
    %cst_40 = arith.constant 2.560000e+02 : f32
    %57 = vector.broadcast %cst_40 : f32 to vector<1x32x1xf32>
    %58 = arith.divf %56, %57 : vector<1x32x1xf32>
    %cst_41 = arith.constant 9.99999974E-6 : f32
    %59 = vector.broadcast %cst_41 : f32 to vector<1x32x1xf32>
    %60 = arith.addf %58, %59 : vector<1x32x1xf32>
    %61 = math.rsqrt %60 : vector<1x32x1xf32>
    %62 = vector.shape_cast %43 : vector<32x1xf32> to vector<1x32x1xf32>
    %63 = arith.mulf %62, %61 : vector<1x32x1xf32>
    %64 = vector.shape_cast %45 : vector<32x1xf32> to vector<1x32x1xf32>
    %65 = arith.subf %64, %63 : vector<1x32x1xf32>
    %66 = arith.mulf %65, %51 : vector<1x32x1xf32>
    %67 = vector.shape_cast %47 : vector<32x1xf32> to vector<1x32x1xf32>
    %68 = arith.addf %66, %67 : vector<1x32x1xf32>
    %69 = vector.broadcast %63 : vector<1x32x1xf32> to vector<1x32x256xf32>
    %70 = arith.mulf %69, %41 : vector<1x32x256xf32>
    %71 = vector.broadcast %68 : vector<1x32x1xf32> to vector<1x32x256xf32>
    %72 = arith.addf %70, %71 : vector<1x32x256xf32>
    %73 = arith.negf %72 : vector<1x32x256xf32>
    %74 = math.exp %73 : vector<1x32x256xf32>
    %cst_42 = arith.constant 1.000000e+00 : f32
    %75 = vector.broadcast %cst_42 : f32 to vector<1x32x256xf32>
    %76 = arith.addf %75, %74 : vector<1x32x256xf32>
    %77 = arith.divf %75, %76 : vector<1x32x256xf32>
    %78 = arith.mulf %41, %77 : vector<1x32x256xf32>
    %c0_43 = arith.constant 0 : index
    %c0_44 = arith.constant 0 : index
    %c256 = arith.constant 256 : index
    %79 = vector.load %arg4[%c0_43, %c0_44, %c256] : memref<1x32x512xf32, #tpu.memory_space<vmem>>, vector<1x32x256xf32>
    tpu.vector_store %arg4[%c0_43, %c0_44, %c256], %78 {strides = array<i32>} : memref<1x32x512xf32, #tpu.memory_space<vmem>>, vector<1x32x256xf32>,
    return
  }
  func.func @transform_0(%arg0: i32, %arg1: i32) -> (i32, i32, i32, i32) {
    %c0_i32 = arith.constant 0 : i32
    %c0_i32_0 = arith.constant 0 : i32
    %c0_i32_1 = arith.constant 0 : i32
    return %arg0, %c0_i32, %arg1, %c0_i32_0 : i32, i32, i32, i32
  }
  func.func @transform_1(%arg0: i32, %arg1: i32) -> (i32, i32, i32, i32) {
    %c0_i32 = arith.constant 0 : i32
    %c0_i32_0 = arith.constant 0 : i32
    %c0_i32_1 = arith.constant 0 : i32
    %c0_i32_2 = arith.constant 0 : i32
    return %c0_i32, %c0_i32_0, %arg1, %c0_i32_1 : i32, i32, i32, i32
  }
  func.func @transform_2(%arg0: i32, %arg1: i32) -> (i32, i32, i32) {
    %c0_i32 = arith.constant 0 : i32
    %c0_i32_0 = arith.constant 0 : i32
    return %arg0, %arg1, %c0_i32 : i32, i32, i32
  }
}

</mosaic_0001>

<bundles_post_ra>
// kernel: tpu_custom_call.1
= control target key start
LH: loop header
LB: loop body
LE: loop exit
PB: predicated region body
PF: predicated region fallthrough
CT: control target
= control target key end

     0   :  { %7 = vsyncpa [#allocation3], 0  ;;  %s2112_s0 = inlined_call_operand.hbm [shape: f32[2,2,32,256], index: 0, kind: input, shape index: {}]   ;;  %s2113_s1 = inlined_call_operand.vmem [shape: f32[3,2,32,1], index: 1, kind: input, shape index: {}]   ;;  %s2114_s2 = inlined_call_operand.hbm [shape: f32[2,32,512], index: 2, kind: output, shape index: {}]  }
   0x1   :  { %9 = vsyncpa [#allocation3 + $0x1], 0 }
   0x2   :  { %10 = vsyncpa [#allocation4], 0 }
   0x3   :  { %12 = vsyncpa [#allocation4 + $0x1], 0  ;;  %s1404_s9 = smov 0   ;;  %s1406_s10 = smov 0  }
   0x4   :  { %s1408_s11 = smov 0   ;;  %s1410_s12 = smov 0  }
   0x5   :  { %s1412_s13 = smov 0   ;;  %s1414_s14 = smov 0  }
   0x6 LB: > { %s1045_s15 = sadd.s32 4294967295, %s1381_s14   ;;  %s1046_s16 = sadd.s32 4294967294, %s1381_s14   ;;  %s1381_s14 = sphi %s1414_s14, %s18_s14   ;;  %s1377_s13 = sphi %s1412_s13, %s2151_s13   ;;  %s1373_s12 = sphi %s1410_s12, %s2150_s12   ;;  %s1369_s11 = sphi %s1408_s11, %s2149_s11   ;;  %s1365_s10 = sphi %s1406_s10, %s2148_s10   ;;  %s1361_s9 = sphi %s1404_s9, %s2147_s9  }
   0x7   : > { %s30_s17 = sadd.s32 1, %s1377_s13  ;;  %s39_s18 = sadd.s32 1, %s1369_s11 }
   0x8   : > { %p32_p0 = scmp.ge.s32.totalorder %s30_s17, 2  ;;  %p46_p1 = scmp.ne.s32.totalorder %s1369_s11, %s1365_s10 }
   0x9   : > { %p47_p2 = scmp.eq.s32.totalorder %s1381_s14, 0  ;;  %p52_p3 = scmp.ne.s32.totalorder %s1365_s10, %s1361_s9 }
   0xa   : > { %s2153_s17 = smov (%p32_p0, %s30_s17), 0  ;;  %p53_p5 = scmp.eq.s32.totalorder %s1045_s15, 0 }
   0xb   : > { %p1445_p4 = por %p47_p2, %p46_p1  ;;  %s34_s20 = ssub.s32 %s1377_s13, %s2153_s17 }
   0xc   : > { %p104_p6 = scmp.eq.s32.totalorder %s1045_s15, 1  ;;  %p37_p7 = scmp.eq.s32.totalorder %s34_s20, 0 }
   0xd   : > { %p1451_p8 = por %p53_p5, %p52_p3  ;;  %p110_p10 = scmp.eq.s32.totalorder %s1046_s16, 1 }
   0xe   : > { %p1455_p9 = por %p104_p6, %p46_p1  ;;  %p1049_p12 = scmp.ge.s32.totalorder %s1381_s14, 2 }
   0xf   : > { %s1460_s23 = scalar_select %p37_p7, %s1369_s11, %s39_s18  }
  0x10   : > { %p1462_p11 = por %p110_p10, %p52_p3  ;;  %p1119_p13 = scmp.lt.s32.totalorder %s1381_s14, 2 }
  0x11   : > { %s139_s25 = sand.u32 1, %s1369_s11   ;;  %s1105_s27 = sshll.u32 %s1377_s13, 7 }
  0x12   : > { %s1050_s26 = sshll.u32 %s139_s25, 7  ;;  %s151_s30 = scalar_lea.hbm %s2112_s0, %s1105_s27 }
  0x13   : > { %s143_s3 = scalar_lea.vmem [#allocation2], %s1050_s26  ;;  %s152_s5 = sshll.u32 %s151_s30, 4  ;;  %s153_s5 = int_to_ptr.hbm [resolvable:$true] %s152_s5 }
  0x14   : > { %s154_s4 = sshll.u32 %s143_s3, 4  ;;  %p1112_p0 = pnand %p1119_p13, %p1445_p4  ;;  %s155_s4 = int_to_ptr.vmem [resolvable:$true] %s154_s4 }
  0x15   : > { %p1053_p1 = scmp.ge.s32.totalorder %s1381_s14, 1  ;;  %s140_s6 = scalar_lea.sflag [#allocation3], %s139_s25 }
  0x16   : > { %s1383_s7 = smov 256   ;;  %s1384_s8 = smov 16  }
  0x17   : > { %1114 = dma.hbm_to_vmem [thread:$0]  (!%p1112_p0), %s153_s5, 2048, %s155_s4, %s140_s6, %s1383_s7, %s1383_s7, %s1384_s8  }
  0x18   : > { %p162_p2 = scmp.lt.s32.totalorder %s1381_s14, 3 }
  0x1a   : > { %p163_p3 = pnand %p1053_p1, %p162_p2 }
  0x1b   : > { %s1478_s15 = sand.u32 (!%p163_p3), 1, %s1365_s10  }
  0x1c   : > { %166 = sbr.rel (%p163_p3) target bundleno = 524 (0x20c), region = 28  ;;  %s1054_s16 = sshll.u32 (!%p163_p3), %s1478_s15, 7 }
  0x1d   : > { %s169_s18 = scalar_lea.sflag (!%p163_p3), [#allocation3], %s1478_s15  ;;  %s1484_s19 = scalar_lea.vmem (!%p163_p3), [#allocation2], %s1054_s16 }
  0x21   : > { %1352 = dma.done.wait (%p1451_p8), %s169_s18, 2048  }
  0x22   : > { %1354 = vsyncadd (%p1451_p8), %s169_s18, 4294965248  ;;  %v1491_v0 = vld [vmem:[%s1484_s19 + $0x40] sm:$0xff]  ;;  %v1494_v1 = vld [vmem:[%s1484_s19 + $0x48] sm:$0xff]  ;;  %v1385_v24 = vmov 256.0   ;;  %s1877_s26 = scalar_lea.vmem [#allocation5], %s1054_s16  ;;  %s1106_s16 = sshll.u32 %s1373_s12, 7 }
  0x23   : > { %v1497_v2 = vld [vmem:[%s1484_s19 + $0x20] sm:$0xff]  ;;  %v592_v3 = vadd.f32 %v1494_v1, %v1491_v0  ;;  %v1502_v4 = vld [vmem:[%s1484_s19 + $0x28] sm:$0xff]  ;;  %v1515_v9 = vld [vmem:[%s1484_s19 + $0x50] sm:$0xff]  ;;  %1178 = vrcp.f32 %v1385_v24  ;;  %s2057_s28 = scalar_lea.hbm %s2114_s2, %s1106_s16  ;;  %s940_s29 = sshll.u32 %s1877_s26, 4  ;;  %s941_s29 = int_to_ptr.vmem [resolvable:$true] %s940_s29 }
  0x24   : > { %v1505_v5 = vld [vmem:[%s1484_s19] sm:$0xff]  ;;  %v1508_v6 = vld [vmem:[%s1484_s19 + $0x8] sm:$0xff]  ;;  %v235_v7 = vadd.f32 %v1502_v4, %v1497_v2  ;;  %v1518_v10 = vld [vmem:[%s1484_s19 + $0x58] sm:$0xff]  ;;  %s942_s30 = sshll.u32 %s2057_s28, 4  ;;  %s925_s3 = scalar_lea.sflag [#allocation4], %s1478_s15  ;;  %s943_s30 = int_to_ptr.hbm [resolvable:$true] %s942_s30 }
  0x25   : > { %v229_v8 = vadd.f32 %v1508_v6, %v1505_v5  ;;  %593 = vadd.xlane.f32.xlu2 %v592_v3  ;;  %v1521_v11 = vld [vmem:[%s1484_s19 + $0x30] sm:$0xff]  ;;  %v1524_v12 = vld [vmem:[%s1484_s19 + $0x38] sm:$0xff]  ;;  %v595_v15 = vadd.f32 %v1518_v10, %v1515_v9  ;;  %v1539_v18 = vld [vmem:[%s1484_s19 + $0x60] sm:$0xff]  ;;  %s1313_s4 = sshra.s32 %s943_s30, 4  ;;  %s1319_s8 = scalar_lea.hbm %s2114_s2, 256  ;;  %s1314_s4 = int_to_ptr.hbm [resolvable:$true] %s1313_s4 }
  0x26   : > { %236 = vadd.xlane.f32.xlu1 %v235_v7  ;;  %v1527_v13 = vld [vmem:[%s1484_s19 + $0x10] sm:$0xff]  ;;  %v1530_v14 = vld [vmem:[%s1484_s19 + $0x18] sm:$0xff]  ;;  %v238_v16 = vadd.f32 %v1524_v12, %v1521_v11  ;;  %v1542_v19 = vld [vmem:[%s1484_s19 + $0x68] sm:$0xff]  ;;  %s1315_s5 = scalar_lea.hbm %s1314_s4, 128  ;;  %p1320_p7 = scmp.lt.s32.totalorder %s1314_s4, %s2114_s2 }
  0x27   : > { %230 = vadd.xlane.f32.xlu0 %v229_v8  ;;  %v232_v17 = vadd.f32 %v1530_v14, %v1527_v13  ;;  %v1545_v20 = vld [vmem:[%s1484_s19 + $0x70] sm:$0xff]  ;;  %v1548_v21 = vld [vmem:[%s1484_s19 + $0x78] sm:$0xff]  ;;  %v598_v22 = vadd.f32 %v1542_v19, %v1539_v18  ;;  %p1316_p4 = scmp.ne.s32.totalorder %s1314_s4, %s1315_s5  ;;  %p1321_p8 = scmp.lt.s32.totalorder %s1319_s8, %s1315_s5 }
  0x28   : > { %v601_v23 = vadd.f32 %v1548_v21, %v1545_v20 }
  0x29   : > { %v1179_v25 = vpop.eup %1178  ;;  %p1317_p5 = pnand %p1316_p4, %p1455_p9  ;;  %p1322_p10 = por %p1321_p8, %p1320_p7 }
  0x2a   : > { %v242_v26 = vmul.f32 256.0, %v1179_v25  ;;  %vm246_vm0 = vweird.f32 %v1179_v25 }
  0x2b   : > { %p1318_p6 = pneg %p1317_p5 }
  0x2c   : > { %v243_v27 = vsub.f32 1.0, %v242_v26 }
  0x2d   : > { %596 = vadd.xlane.f32.xlu2 %v595_v15  ;;  %p1323_p13 = pnand %p1322_p10, %p1318_p6 }
  0x2e   : > { %239 = vadd.xlane.f32.xlu1 %v238_v16  ;;  %v244_v28 = vmul.f32 %v1179_v25, %v243_v27 }
  0x2f   : > { %233 = vadd.xlane.f32.xlu0 %v232_v17 }
  0x30   : > { %v245_v29 = vadd.f32 %v1179_v25, %v244_v28 }
  0x32   : > { %v1554_v30 = vsel %vm246_vm0, %v1179_v25, %v245_v29 }
  0x36   : > { %602 = vadd.xlane.f32.xlu1 %v601_v23 }
  0x37   : > { %599 = vadd.xlane.f32.xlu0 %v598_v22 }
  0x98   : > { %v594_v31 = vpop.xlane.xlu2 %593 }
  0x99   : > { %v237_v32 = vpop.xlane.xlu1 %236  ;;  %v1592_v58 = vmul.f32 %v594_v31, %v1554_v30 }
  0x9a   : > { %v231_v33 = vpop.xlane.xlu0 %230  ;;  %v1557_v34 = vmul.f32 %v1554_v30, %v237_v32 }
  0x9b   : > { %v1560_v35 = vmul.f32 %v1554_v30, %v231_v33  ;;  %v608_v22 = vsub.f32 %v1491_v0, %v1592_v58  ;;  %v609_v23 = vsub.f32 %v1494_v1, %v1592_v58 }
  0x9c   : > { %v256_v36 = vsub.f32 %v1497_v2, %v1557_v34  ;;  %v257_v37 = vsub.f32 %v1502_v4, %v1557_v34 }
  0x9d   : > { %v252_v38 = vsub.f32 %v1505_v5, %v1560_v35  ;;  %v253_v39 = vsub.f32 %v1508_v6, %v1560_v35  ;;  %v616_v28 = vmul.f32 %v608_v22, %v608_v22  ;;  %v617_v29 = vmul.f32 %v609_v23, %v609_v23 }
  0x9e   : > { %v264_v40 = vmul.f32 %v256_v36, %v256_v36  ;;  %v265_v41 = vmul.f32 %v257_v37, %v257_v37 }
  0x9f   : > { %v260_v42 = vmul.f32 %v252_v38, %v252_v38  ;;  %v261_v43 = vmul.f32 %v253_v39, %v253_v39  ;;  %v624_v38 = vadd.f32 %v617_v29, %v616_v28 }
  0xa0   : > { %v597_v44 = vpop.xlane.xlu2 %596  ;;  %v274_v45 = vadd.f32 %v265_v41, %v264_v40 }
  0xa1   : > { %v268_v46 = vadd.f32 %v261_v43, %v260_v42  ;;  %v1571_v47 = vmul.f32 %v597_v44, %v1554_v30  ;;  %v240_v48 = vpop.xlane.xlu1 %239  ;;  %v1386_v42 = vmov 0  }
  0xa2   : > { %v234_v49 = vpop.xlane.xlu0 %233  ;;  %v1574_v50 = vmul.f32 %v1554_v30, %v240_v48  ;;  %275 = vadd.xlane.f32.xlu1 %v274_v45  ;;  %1177 = vset.pattern.permute.xlu0 %v1386_v42 }
  0xa3   : > { %v1577_v51 = vmul.f32 %v1554_v30, %v234_v49  ;;  %269 = vadd.xlane.f32.xlu2 %v268_v46  ;;  %v610_v52 = vsub.f32 %v1515_v9, %v1571_v47  ;;  %v611_v53 = vsub.f32 %v1518_v10, %v1571_v47  ;;  %1175 = vset.pattern.permute.xlu1 %v1386_v42 }
  0xa4   : > { %v258_v54 = vsub.f32 %v1521_v11, %v1574_v50  ;;  %v259_v55 = vsub.f32 %v1524_v12, %v1574_v50  ;;  %1176 = vset.pattern.permute.xlu2 %v1386_v42 }
  0xa5   : > { %v254_v56 = vsub.f32 %v1527_v13, %v1577_v51  ;;  %v255_v57 = vsub.f32 %v1530_v14, %v1577_v51  ;;  %v618_v59 = vmul.f32 %v610_v52, %v610_v52  ;;  %v619_v60 = vmul.f32 %v611_v53, %v611_v53 }
  0xa6   : > { %v266_v61 = vmul.f32 %v258_v54, %v258_v54  ;;  %v267_v62 = vmul.f32 %v259_v55, %v259_v55 }
  0xa7   : > { %v262_v63 = vmul.f32 %v254_v56, %v254_v56  ;;  %v263_v3 = vmul.f32 %v255_v57, %v255_v57  ;;  %v627_v7 = vadd.f32 %v619_v60, %v618_v59 }
  0xa8   : > { %v277_v8 = vadd.f32 %v267_v62, %v266_v61 }
  0xa9   : > { %v271_v15 = vadd.f32 %v263_v3, %v262_v63  ;;  %v603_v17 = vpop.xlane.xlu1 %602 }
  0xaa   : > { %v600_v16 = vpop.xlane.xlu0 %599  ;;  %628 = vadd.xlane.f32.xlu1 %v627_v7  ;;  %v1602_v25 = vmul.f32 %v603_v17, %v1554_v30 }
  0xab   : > { %v1599_v24 = vmul.f32 %v600_v16, %v1554_v30  ;;  %278 = vadd.xlane.f32.xlu2 %v277_v8  ;;  %272 = vadd.xlane.f32.xlu0 %v271_v15 }
  0xac   : > { %v614_v33 = vsub.f32 %v1545_v20, %v1602_v25  ;;  %v615_v36 = vsub.f32 %v1548_v21, %v1602_v25 }
  0xad   : > { %v612_v26 = vsub.f32 %v1539_v18, %v1599_v24  ;;  %v613_v27 = vsub.f32 %v1542_v19, %v1599_v24 }
  0xae   : > { %v622_v39 = vmul.f32 %v614_v33, %v614_v33  ;;  %v623_v40 = vmul.f32 %v615_v36, %v615_v36 }
  0xaf   : > { %v620_v31 = vmul.f32 %v612_v26, %v612_v26  ;;  %v621_v32 = vmul.f32 %v613_v27, %v613_v27 }
  0xb0   : > { %v633_v41 = vadd.f32 %v623_v40, %v622_v39 }
  0xb1   : > { %v630_v37 = vadd.f32 %v621_v32, %v620_v31 }
  0xb3   : > { %631 = vadd.xlane.f32.xlu2 %v630_v37  ;;  %625 = vadd.xlane.f32.xlu0 %v624_v38 }
  0xbb   : > { %634 = vadd.xlane.f32.xlu0 %v633_v41  ;;  %v217_v41 = vld [vmem:[%s2113_s1 + $0x10] sm:$0xff] }
 0x115   : > { %v276_v43 = vpop.xlane.xlu1 %275 }
 0x116   : > { %v270_v44 = vpop.xlane.xlu2 %269  ;;  %v282_v45 = vmul.f32 %v276_v43, %v1554_v30 }
 0x117   : > { %v280_v46 = vmul.f32 %v270_v44, %v1554_v30 }
 0x118   : > { %v286_v48 = vadd.f32 1e-05, %v282_v45  ;;  %v215_v45 = vld [vmem:[%s2113_s1] sm:$0xff] }
 0x119   : > { %v284_v49 = vadd.f32 1e-05, %v280_v46 }
 0x11a   : > { %1180 = vrsqrt.f32 %v286_v48  ;;  %vm314_vm2 = vweird.f32 %v286_v48 }
 0x11b   : > { %1182 = vrsqrt.f32 %v284_v49  ;;  %vm294_vm5 = vweird.f32 %v284_v49 }
 0x11d   : > { %v629_v52 = vpop.xlane.xlu1 %628 }
 0x11e   : > { %v279_v53 = vpop.xlane.xlu2 %278  ;;  %v637_v54 = vmul.f32 %v629_v52, %v1554_v30  ;;  %v273_v56 = vpop.xlane.xlu0 %272 }
 0x11f   : > { %v283_v55 = vmul.f32 %v279_v53, %v1554_v30  ;;  %v281_v57 = vmul.f32 %v273_v56, %v1554_v30 }
 0x120   : > { %v1181_v59 = vpop.eup %1180  ;;  %v1617_v60 = vadd.f32 1e-05, %v637_v54 }
 0x121   : > { %v1619_v61 = vadd.f32 1e-05, %v283_v55  ;;  %v1183_v62 = vpop.eup %1182  ;;  %v309_v63 = vmul.f32 %v1181_v59, %v286_v48  ;;  %v1621_v3 = vadd.f32 1e-05, %v281_v57  ;;  %vm315_vm1 = vweird.f32 %v1181_v59 }
 0x122   : > { %v289_v7 = vmul.f32 %v1183_v62, %v284_v49  ;;  %1184 = vrsqrt.f32 %v1617_v60  ;;  %vm295_vm3 = vweird.f32 %v1183_v62  ;;  %vm316_vm4 = vmor %vm314_vm2, %vm315_vm1  ;;  %vm660_vm10 = vweird.f32 %v1617_v60 }
 0x123   : > { %v310_v8 = vmul.f32 %v1181_v59, %v309_v63  ;;  %1186 = vrsqrt.f32 %v1619_v61  ;;  %vm296_vm6 = vmor %vm294_vm5, %vm295_vm3  ;;  %vm304_vm8 = vweird.f32 %v1621_v3  ;;  %vm324_vm13 = vweird.f32 %v1619_v61 }
 0x124   : > { %v290_v15 = vmul.f32 %v1183_v62, %v289_v7  ;;  %1188 = vrsqrt.f32 %v1621_v3 }
 0x125   : > { %v311_v16 = vmul.f32 0.5, %v310_v8 }
 0x126   : > { %v632_v17 = vpop.xlane.xlu2 %631  ;;  %v291_v22 = vmul.f32 0.5, %v290_v15  ;;  %v626_v26 = vpop.xlane.xlu0 %625 }
 0x127   : > { %v638_v23 = vmul.f32 %v632_v17, %v1554_v30  ;;  %v312_v27 = vsub.f32 1.5, %v311_v16  ;;  %v636_v28 = vmul.f32 %v626_v26, %v1554_v30 }
 0x128   : > { %v1185_v29 = vpop.eup %1184  ;;  %v292_v31 = vsub.f32 1.5, %v291_v22 }
 0x129   : > { %v1628_v32 = vadd.f32 1e-05, %v638_v23  ;;  %v1630_v33 = vpop.eup %1186  ;;  %v655_v36 = vmul.f32 %v1185_v29, %v1617_v60  ;;  %v1633_v37 = vadd.f32 1e-05, %v636_v28  ;;  %v313_v38 = vmul.f32 %v1181_v59, %v312_v27  ;;  %v216_v28 = vld [vmem:[%s2113_s1 + $0x8] sm:$0xff] }
 0x12a   : > { %v1189_v39 = vpop.eup %1188  ;;  %v319_v40 = vmul.f32 %v1630_v33, %v1619_v61  ;;  %v293_v46 = vmul.f32 %v1183_v62, %v292_v31  ;;  %vm661_vm7 = vweird.f32 %v1185_v29  ;;  %vm325_vm14 = vweird.f32 %v1630_v33  ;;  %v1080_v61 = vld [vmem:[%s2113_s1 + $0x20] sm:$0xff] }
 0x12b   : > { %1190 = vrsqrt.f32 %v1628_v32  ;;  %v656_v42 = vmul.f32 %v1185_v29, %v655_v36  ;;  %v299_v43 = vmul.f32 %v1189_v39, %v1621_v3  ;;  %v317_v48 = vsel %vm316_vm4, %v1181_v59, %v313_v38  ;;  %vm662_vm11 = vmor %vm660_vm10, %vm661_vm7  ;;  %v1056_v36 = vld [vmem:[%s2113_s1 + $0x40] sm:$0xff] }
 0x12c   : > { %1192 = vrsqrt.f32 %v1633_v37  ;;  %v320_v44 = vmul.f32 %v1630_v33, %v319_v40  ;;  %v1647_v54 = vmul.f32 %v317_v48, %v217_v41  ;;  %v297_v57 = vsel %vm296_vm6, %v1183_v62, %v293_v46  ;;  %vm1680_vm2 = vmor %vm324_vm13, %vm325_vm14 }
 0x12d   : > { %v657_v52 = vmul.f32 0.5, %v656_v42  ;;  %v300_v53 = vmul.f32 %v1189_v39, %v299_v43  ;;  %v328_v8 = vmul.f32 %v297_v57, %v215_v45  ;;  %vm305_vm9 = vweird.f32 %v1189_v39 }
 0x12e   : > { %v321_v55 = vmul.f32 0.5, %v320_v44  ;;  %v635_v56 = vpop.xlane.xlu0 %634  ;;  %356 = vperm.xlu0 %1177, %v1647_v54   ;;  %vm306_vm12 = vmor %vm304_vm8, %vm305_vm9  ;;  %vm670_vm15 = vweird.f32 %v1628_v32  ;;  %vm650_vm4 = vweird.f32 %v1633_v37 }
 0x12f   : > { %v658_v63 = vsub.f32 1.5, %v657_v52  ;;  %v301_v7 = vmul.f32 0.5, %v300_v53  ;;  %v639_v49 = vmul.f32 %v635_v56, %v1554_v30  ;;  %346 = vperm.xlu1 %1175, %v328_v8   ;;  %v1081_v30 = vld [vmem:[%s2113_s1 + $0x28] sm:$0xff]  ;;  %v332_v45 = vsub.f32 %v1056_v36, %v328_v8  ;;  %v1082_v52 = vld [vmem:[%s2113_s1 + $0x30] sm:$0xff]  ;;  %v1060_v8 = vld [vmem:[%s2113_s1 + $0x80] sm:$0xff] }
 0x130   : > { %v322_v26 = vsub.f32 1.5, %v321_v55  ;;  %v1062_v36 = vld [vmem:[%s2113_s1 + $0x90] sm:$0xff] }
 0x131   : > { %v1191_v15 = vpop.eup %1190  ;;  %v302_v16 = vsub.f32 1.5, %v301_v7  ;;  %v1653_v22 = vadd.f32 1e-05, %v639_v49  ;;  %v659_v23 = vmul.f32 %v1185_v29, %v658_v63  ;;  %v336_v57 = vmul.f32 %v332_v45, %v1560_v35  ;;  %v218_v7 = vld [vmem:[%s2113_s1 + $0x18] sm:$0xff]  ;;  %v1058_v49 = vld [vmem:[%s2113_s1 + $0x50] sm:$0xff]  ;;  %v1084_v35 = vld [vmem:[%s2113_s1 + $0x60] sm:$0xff] }
 0x132   : > { %v1193_v59 = vpop.eup %1192  ;;  %v665_v17 = vmul.f32 %v1191_v15, %v1628_v32  ;;  %vm671_vm0 = vweird.f32 %v1191_v15  ;;  %v323_v46 = vmul.f32 %v1630_v33, %v322_v26 }
 0x133   : > { %v645_v62 = vmul.f32 %v1193_v59, %v1633_v37  ;;  %1194 = vrsqrt.f32 %v1653_v22  ;;  %v303_v31 = vmul.f32 %v1189_v39, %v302_v16  ;;  %v663_v38 = vsel %vm662_vm11, %v1185_v29, %v659_v23  ;;  %vm672_vm3 = vmor %vm670_vm15, %vm671_vm0 }
 0x134   : > { %v666_v27 = vmul.f32 %v1191_v15, %v665_v17  ;;  %v1670_v41 = vmul.f32 %v1081_v30, %v663_v38  ;;  %vm651_vm1 = vweird.f32 %v1193_v59  ;;  %v327_v32 = vsel %vm1680_vm2, %v1630_v33, %v323_v46 }
 0x135   : > { %v646_v60 = vmul.f32 %v1193_v59, %v645_v62  ;;  %v307_v42 = vsel %vm306_vm12, %v1189_v39, %v303_v31  ;;  %vm652_vm5 = vmor %vm650_vm4, %vm651_vm1  ;;  %v331_v30 = vmul.f32 %v327_v32, %v218_v7  ;;  %v334_v33 = vsub.f32 %v1058_v49, %v1647_v54  ;;  %v1083_v31 = vld [vmem:[%s2113_s1 + $0x38] sm:$0xff] }
 0x136   : > { %v667_v40 = vmul.f32 0.5, %v666_v27  ;;  %v1674_v44 = vmul.f32 %v307_v42, %v216_v28  ;;  %v340_v23 = vadd.f32 %v1060_v8, %v336_v57  ;;  %vm680_vm6 = vweird.f32 %v1653_v22  ;;  %v1088_v28 = vld [vmem:[%s2113_s1 + $0xa0] sm:$0xff] }
 0x137   : > { %v647_v43 = vmul.f32 0.5, %v646_v60  ;;  %707 = vperm.xlu1 %1175, %v1670_v41   ;;  %v338_v54 = vmul.f32 %v334_v33, %v1557_v34  ;;  %v1091_v34 = vld [vmem:[%s2113_s1 + $0xb8] sm:$0xff] }
 0x138   : > { %v668_v3 = vsub.f32 1.5, %v667_v40  ;;  %351 = vperm.xlu2 %1176, %v1674_v44  }
 0x139   : > { %v648_v48 = vsub.f32 1.5, %v647_v43  ;;  %v1195_v29 = vpop.eup %1194 }
 0x13a   : > { %v669_v53 = vmul.f32 %v1191_v15, %v668_v3  ;;  %v675_v55 = vmul.f32 %v1195_v29, %v1653_v22  ;;  %vm681_vm7 = vweird.f32 %v1195_v29  ;;  %v1059_v22 = vld [vmem:[%s2113_s1 + $0x58] sm:$0xff]  ;;  %v342_v3 = vadd.f32 %v1062_v36, %v338_v54 }
 0x13b   : > { %v649_v56 = vmul.f32 %v1193_v59, %v648_v48  ;;  %vm682_vm8 = vmor %vm680_vm6, %vm681_vm7  ;;  %v335_v43 = vsub.f32 %v1059_v22, %v331_v30  ;;  %v1057_v48 = vld [vmem:[%s2113_s1 + $0x48] sm:$0xff] }
 0x13c   : > { %v673_v63 = vsel %vm672_vm3, %v1191_v15, %v669_v53  ;;  %v676_v37 = vmul.f32 %v1195_v29, %v675_v55  ;;  %v333_v55 = vsub.f32 %v1057_v48, %v1674_v44  ;;  %v1090_v44 = vld [vmem:[%s2113_s1 + $0xb0] sm:$0xff] }
 0x13d   : > { %v686_v16 = vmul.f32 %v1082_v52, %v673_v63  ;;  %v653_v15 = vsel %vm652_vm5, %v1193_v59, %v649_v56  ;;  %v339_v39 = vmul.f32 %v335_v43, %v1574_v50  ;;  %v1063_v52 = vld [vmem:[%s2113_s1 + $0x98] sm:$0xff]  ;;  %v1085_v50 = vld [vmem:[%s2113_s1 + $0x68] sm:$0xff] }
 0x13e   : > { %v684_v17 = vmul.f32 %v1080_v61, %v653_v15  ;;  %v677_v62 = vmul.f32 0.5, %v676_v37  ;;  %v337_v56 = vmul.f32 %v333_v55, %v1577_v51  ;;  %v1061_v63 = vld [vmem:[%s2113_s1 + $0x88] sm:$0xff]  ;;  %v689_v7 = vsub.f32 %v1085_v50, %v1670_v41 }
 0x13f   : > { %712 = vperm.xlu0 %1177, %v686_v16   ;;  %374 = vperm.xlu1 %1175, %v340_v23  }
 0x140   : > { %v688_v26 = vsub.f32 %v1084_v35, %v684_v17  ;;  %v678_v27 = vsub.f32 1.5, %v677_v62  ;;  %361 = vperm.xlu2 %1176, %v331_v30   ;;  %v341_v32 = vadd.f32 %v1061_v63, %v337_v56  ;;  %v693_v51 = vmul.f32 %v689_v7, %v1571_v47 }
 0x142   : > { %v692_v59 = vmul.f32 %v688_v26, %v1592_v58  ;;  %v679_v60 = vmul.f32 %v1195_v29, %v678_v27  ;;  %v1087_v58 = vld [vmem:[%s2113_s1 + $0x78] sm:$0xff] }
 0x144   : > { %v696_v38 = vadd.f32 %v1088_v28, %v692_v59  ;;  %v683_v40 = vsel %vm682_vm8, %v1195_v29, %v679_v60  ;;  %v1086_v29 = vld [vmem:[%s2113_s1 + $0x70] sm:$0xff] }
 0x145   : > { %v687_v42 = vmul.f32 %v1083_v31, %v683_v40  ;;  %v690_v61 = vsub.f32 %v1086_v29, %v686_v16 }
 0x147   : > { %730 = vperm.xlu0 %1177, %v696_v38   ;;  %v691_v45 = vsub.f32 %v1087_v58, %v687_v42  ;;  %384 = vperm.xlu1 %1175, %v342_v3   ;;  %v694_v57 = vmul.f32 %v690_v61, %v1599_v24  ;;  %v1089_v24 = vld [vmem:[%s2113_s1 + $0xa8] sm:$0xff] }
 0x148   : > { %702 = vperm.xlu2 %1176, %v684_v17   ;;  %v697_v49 = vadd.f32 %v1089_v24, %v693_v51 }
 0x149   : > { %v695_v46 = vmul.f32 %v691_v45, %v1602_v25  ;;  %v343_v25 = vadd.f32 %v1063_v52, %v339_v39  ;;  %v698_v37 = vadd.f32 %v1090_v44, %v694_v57 }
 0x14b   : > { %v699_v53 = vadd.f32 %v1091_v34, %v695_v46 }
 0x14f   : > { %745 = vperm.xlu0 %1177, %v699_v53   ;;  %389 = vperm.xlu1 %1175, %v343_v25  }
 0x150   : > { %717 = vperm.xlu2 %1176, %v687_v42  }
 0x157   : > { %740 = vperm.xlu1 %1175, %v698_v37  }
 0x158   : > { %379 = vperm.xlu2 %1176, %v341_v32  }
 0x160   : > { %735 = vperm.xlu2 %1176, %v697_v49  }
 0x192   : > { %v352_v8 = vpop.permute.xlu2 %351 }
 0x193   : > { %v366_v33 = vmul.f32 %v352_v8, %v1527_v13  ;;  %v367_v23 = vmul.f32 %v352_v8, %v1530_v14 }
 0x19a   : > { %v362_v16 = vpop.permute.xlu2 %361 }
 0x19b   : > { %v1776_v32 = vmul.f32 %v362_v16, %v1521_v11  ;;  %v1782_v24 = vmul.f32 %v362_v16, %v1524_v12 }
 0x1a0   : > { %v357_v17 = vpop.permute.xlu0 %356 }
 0x1a1   : > { %v347_v15 = vpop.permute.xlu1 %346  ;;  %v368_v34 = vmul.f32 %v357_v17, %v1497_v2  ;;  %v369_v53 = vmul.f32 %v357_v17, %v1502_v4 }
 0x1a2   : > { %v703_v35 = vpop.permute.xlu2 %702  ;;  %v364_v47 = vmul.f32 %v347_v15, %v1505_v5  ;;  %v365_v26 = vmul.f32 %v347_v15, %v1508_v6 }
 0x1a3   : > { %v720_v40 = vmul.f32 %v1491_v0, %v703_v35  ;;  %v721_v43 = vmul.f32 %v1494_v1, %v703_v35 }
 0x1a9   : > { %v708_v30 = vpop.permute.xlu1 %707 }
 0x1aa   : > { %v718_v62 = vpop.permute.xlu2 %717  ;;  %v722_v3 = vmul.f32 %v1515_v9, %v708_v30  ;;  %v723_v57 = vmul.f32 %v1518_v10, %v708_v30 }
 0x1ab   : > { %v1785_v49 = vmul.f32 %v1545_v20, %v718_v62  ;;  %v1789_v8 = vmul.f32 %v1548_v21, %v718_v62 }
 0x1b1   : > { %v713_v41 = vpop.permute.xlu0 %712  ;;  %v375_v28 = vpop.permute.xlu1 %374 }
 0x1b2   : > { %v380_v27 = vpop.permute.xlu2 %379  ;;  %v392_v60 = vadd.f32 %v375_v28, %v364_v47  ;;  %v393_v54 = vadd.f32 %v375_v28, %v365_v26  ;;  %v1793_v11 = vmul.f32 %v1539_v18, %v713_v41  ;;  %v1799_v12 = vmul.f32 %v1542_v19, %v713_v41 }
 0x1b3   : > { %v394_v59 = vadd.f32 %v380_v27, %v366_v33  ;;  %v395_v31 = vadd.f32 %v380_v27, %v367_v23 }
 0x1b4   : > { %v1064_v36 = vmul.f32 -1.442695, %v392_v60  ;;  %v1065_v38 = vmul.f32 -1.442695, %v393_v54 }
 0x1b5   : > { %v1066_v22 = vmul.f32 -1.442695, %v394_v59  ;;  %v1067_v58 = vmul.f32 -1.442695, %v395_v31 }
 0x1b7   : > { %1196 = vpow2.f32 %v1066_v22 }
 0x1b8   : > { %1198 = vpow2.f32 %v1064_v36 }
 0x1b9   : > { %v731_v42 = vpop.permute.xlu0 %730  ;;  %1200 = vpow2.f32 %v1065_v38  ;;  %v385_v48 = vpop.permute.xlu1 %384 }
 0x1ba   : > { %v748_v45 = vadd.f32 %v731_v42, %v720_v40  ;;  %1202 = vpow2.f32 %v1067_v58  ;;  %v736_v46 = vpop.permute.xlu2 %735  ;;  %v749_v29 = vadd.f32 %v731_v42, %v721_v43  ;;  %v396_v0 = vadd.f32 %v385_v48, %v368_v34 }
 0x1bb   : > { %v750_v39 = vadd.f32 %v736_v46, %v722_v3  ;;  %v397_v1 = vadd.f32 %v385_v48, %v369_v53  ;;  %v751_v10 = vadd.f32 %v736_v46, %v723_v57 }
 0x1bc   : > { %v1092_v52 = vmul.f32 -1.442695, %v748_v45  ;;  %v1093_v44 = vmul.f32 -1.442695, %v749_v29  ;;  %v1068_v51 = vmul.f32 -1.442695, %v396_v0 }
 0x1bd   : > { %v1197_v55 = vpop.eup %1196  ;;  %v1094_v61 = vmul.f32 -1.442695, %v750_v39  ;;  %v1069_v35 = vmul.f32 -1.442695, %v397_v1  ;;  %v1095_v23 = vmul.f32 -1.442695, %v751_v10 }
 0x1be   : > { %v1199_v25 = vpop.eup %1198  ;;  %v1770_v56 = vadd.f32 1.0, %v1197_v55  ;;  %1204 = vpow2.f32 %v1092_v52 }
 0x1bf   : > { %v1201_v50 = vpop.eup %1200  ;;  %v1773_v63 = vadd.f32 1.0, %v1199_v25  ;;  %1206 = vpow2.f32 %v1094_v61 }
 0x1c0   : > { %v1203_v7 = vpop.eup %1202  ;;  %v1778_v37 = vadd.f32 1.0, %v1201_v50  ;;  %1208 = vrcp.f32 %v1770_v56  ;;  %v471_v62 = vand.u32 2147483647, %v1770_v56  ;;  %v473_v33 = vand.u32 2147483648, %v1770_v56 }
 0x1c1   : > { %1210 = vrcp.f32 %v1773_v63  ;;  %v443_v15 = vand.u32 2147483648, %v1773_v63  ;;  %v1796_v17 = vadd.f32 1.0, %v1203_v7  ;;  %v441_v16 = vand.u32 2147483647, %v1773_v63 }
 0x1c2   : > { %1212 = vrcp.f32 %v1778_v37  ;;  %v458_v21 = vand.u32 2147483648, %v1778_v37  ;;  %v456_v18 = vand.u32 2147483647, %v1778_v37  ;;  %vm437_vm9 = vweird.f32 %v1773_v63 }
 0x1c3   : > { %1214 = vpow2.f32 %v1093_v44  ;;  %vm467_vm10 = vweird.f32 %v1770_v56  ;;  %v488_v19 = vand.u32 2147483648, %v1796_v17  ;;  %v444_v26 = vor.u32 1.1754944e-38, %v443_v15 }
 0x1c4   : > { %v1205_v20 = vpop.eup %1204  ;;  %1216 = vpow2.f32 %v1068_v51  ;;  %vm452_vm11 = vweird.f32 %v1778_v37  ;;  %vm1815_vm12 = vcmp.eq.f32.partialorder %v441_v16, 8.507059e+37  ;;  %v459_v54 = vor.u32 1.1754944e-38, %v458_v21 }
 0x1c5   : > { %v1207_v30 = vpop.eup %1206  ;;  %1218 = vrcp.f32 %v1796_v17  ;;  %vm1819_vm13 = vcmp.eq.f32.partialorder %v471_v62, 8.507059e+37  ;;  %v486_v36 = vand.u32 2147483647, %v1796_v17  ;;  %vm1825_vm14 = vcmp.eq.f32.partialorder %v456_v18, 8.507059e+37 }
 0x1c6   : > { %v1209_v47 = vpop.eup %1208  ;;  %1220 = vpow2.f32 %v1069_v35  ;;  %v1812_v28 = vadd.f32 1.0, %v1207_v30  ;;  %v474_v43 = vor.u32 1.1754944e-38, %v473_v33  ;;  %v1829_v3 = vadd.f32 1.0, %v1205_v20 }
 0x1c7   : > { %v1211_v41 = vpop.eup %1210  ;;  %v463_v27 = vmul.f32 %v1209_v47, %v1770_v56  ;;  %vm468_vm15 = vweird.f32 %v1209_v47  ;;  %vm482_vm0 = vweird.f32 %v1796_v17  ;;  %v489_v46 = vor.u32 1.1754944e-38, %v488_v19 }
 0x1c8   : > { %v1213_v59 = vpop.eup %1212  ;;  %v433_v31 = vmul.f32 %v1211_v41, %v1773_v63  ;;  %1222 = vpow2.f32 %v1095_v23  ;;  %vm438_vm1 = vweird.f32 %v1211_v41  ;;  %vm1836_vm3 = vcmp.eq.f32.partialorder %v486_v36, 8.507059e+37  ;;  %vm469_vm4 = vmor %vm467_vm10, %vm468_vm15 }
 0x1c9   : > { %v1215_v38 = vpop.eup %1214  ;;  %v448_v58 = vmul.f32 %v1213_v59, %v1778_v37  ;;  %v464_v42 = vsub.f32 1.0, %v463_v27  ;;  %1224 = vrcp.f32 %v1812_v28  ;;  %vm453_vm2 = vweird.f32 %v1213_v59  ;;  %vm439_vm5 = vmor %vm437_vm9, %vm438_vm1 }
 0x1ca   : > { %v1217_v45 = vpop.eup %1216  ;;  %v434_v34 = vsub.f32 1.0, %v433_v31  ;;  %v827_v7 = vand.u32 2147483647, %v1812_v28  ;;  %vm454_vm7 = vmor %vm452_vm11, %vm453_vm2  ;;  %vm823_vm9 = vweird.f32 %v1812_v28 }
 0x1cb   : > { %v1219_v48 = vpop.eup %1218  ;;  %v449_v39 = vsub.f32 1.0, %v448_v58  ;;  %v465_v29 = vmul.f32 %v1209_v47, %v464_v42  ;;  %v1832_v52 = vadd.f32 1.0, %v1217_v45 }
 0x1cc   : > { %v1221_v53 = vpop.eup %1220  ;;  %v435_v0 = vmul.f32 %v1211_v41, %v434_v34  ;;  %v478_v55 = vmul.f32 %v1219_v48, %v1796_v17  ;;  %vm483_vm6 = vweird.f32 %v1219_v48 }
 0x1cd   : > { %v450_v25 = vmul.f32 %v1213_v59, %v449_v39  ;;  %v466_v1 = vadd.f32 %v1209_v47, %v465_v29  ;;  %v1840_v50 = vadd.f32 1.0, %v1221_v53  ;;  %1226 = vrcp.f32 %v1832_v52  ;;  %vm1871_vm8 = vmor %vm482_vm0, %vm483_vm6 }
 0x1ce   : > { %v436_v57 = vadd.f32 %v1211_v41, %v435_v0  ;;  %v479_v44 = vsub.f32 1.0, %v478_v55  ;;  %1228 = vrcp.f32 %v1829_v3  ;;  %v1223_v35 = vpop.eup %1222  ;;  %v501_v16 = vand.u32 2147483647, %v1832_v52 }
 0x1cf   : > { %v451_v51 = vadd.f32 %v1213_v59, %v450_v25  ;;  %v470_v10 = vsel %vm469_vm4, %v1209_v47, %v466_v1  ;;  %1230 = vrcp.f32 %v1840_v50  ;;  %v1857_v63 = vpop.eup %1224  ;;  %v503_v18 = vand.u32 2147483648, %v1832_v52 }
 0x1d0   : > { %v440_v15 = vsel %vm439_vm5, %v1211_v41, %v436_v57  ;;  %v475_v56 = vsel %vm1819_vm13, %v474_v43, %v470_v10  ;;  %v480_v20 = vmul.f32 %v1219_v48, %v479_v44  ;;  %v829_v47 = vand.u32 2147483648, %v1812_v28 }
 0x1d1   : > { %v445_v21 = vsel %vm1815_vm12, %v444_v26, %v440_v15  ;;  %v455_v62 = vsel %vm454_vm7, %v1213_v59, %v451_v51  ;;  %v554_v30 = vmul.f32 %v475_v56, %v1527_v13  ;;  %v1881_v13 = vadd.f32 1.0, %v1223_v35 }
 0x1d2   : > { %v460_v37 = vsel %vm1825_vm14, %v459_v54, %v455_v62  ;;  %v552_v33 = vmul.f32 %v445_v21, %v1505_v5  ;;  %v481_v23 = vadd.f32 %v1219_v48, %v480_v20  ;;  %v516_v5 = vand.u32 2147483647, %v1840_v50 }
 0x1d3   : > { %v1227_v19 = vpop.eup %1226  ;;  %v553_v41 = vmul.f32 %v460_v37, %v1508_v6  ;;  %562 = vst [vmem:[%s1877_s26 + $0x20] sm:$0xff] %v554_v30  ;;  %v1884_v6 = vadd.f32 1.0, %v1215_v38  ;;  %v518_v31 = vand.u32 2147483648, %v1840_v50  ;;  %v819_v60 = vmul.f32 %v1857_v63, %v1812_v28  ;;  %v746_v37 = vpop.permute.xlu0 %745 }
 0x1d4   : > { %v1886_v17 = vpop.eup %1228  ;;  %560 = vst [vmem:[%s1877_s26] sm:$0xff] %v552_v33  ;;  %v485_v27 = vsel %vm1871_vm8, %v1219_v48, %v481_v23  ;;  %v493_v59 = vmul.f32 %v1227_v19, %v1832_v52  ;;  %vm497_vm10 = vweird.f32 %v1832_v52  ;;  %vm1899_vm11 = vcmp.eq.f32.partialorder %v501_v16, 8.507059e+37 }
 0x1d5   : > { %v1231_v54 = vpop.eup %1230  ;;  %561 = vst [vmem:[%s1877_s26 + $0x8] sm:$0xff] %v553_v41  ;;  %v490_v22 = vsel %vm1836_vm3, %v489_v46, %v485_v27  ;;  %v504_v38 = vor.u32 1.1754944e-38, %v503_v18  ;;  %vm1903_vm12 = vcmp.eq.f32.partialorder %v827_v7, 8.507059e+37  ;;  %vm512_vm13 = vweird.f32 %v1840_v50 }
 0x1d6   : > { %v555_v40 = vmul.f32 %v490_v22, %v1530_v14  ;;  %v494_v42 = vsub.f32 1.0, %v493_v59  ;;  %v508_v43 = vmul.f32 %v1231_v54, %v1840_v50  ;;  %vm498_vm14 = vweird.f32 %v1227_v19  ;;  %v390_v14 = vpop.permute.xlu1 %389 }
 0x1d7   : > { %vm1910_vm15 = vcmp.eq.f32.partialorder %v516_v5, 8.507059e+37  ;;  %v820_v34 = vsub.f32 1.0, %v819_v60  ;;  %1232 = vrcp.f32 %v1881_v13  ;;  %v519_v39 = vor.u32 1.1754944e-38, %v518_v31  ;;  %vm499_vm2 = vmor %vm497_vm10, %vm498_vm14  ;;  %v1260_v60 = vld [vmem:[%s1484_s19 + $0x40] sm:$0xff] }
 0x1d8   : > { %563 = vst [vmem:[%s1877_s26 + $0x28] sm:$0xff] %v555_v40  ;;  %v495_v46 = vmul.f32 %v1227_v19, %v494_v42  ;;  %v509_v48 = vsub.f32 1.0, %v508_v43  ;;  %vm824_vm0 = vweird.f32 %v1857_v63  ;;  %vm513_vm1 = vweird.f32 %v1231_v54 }
 0x1d9   : > { %v821_v29 = vmul.f32 %v1857_v63, %v820_v34  ;;  %v830_v53 = vor.u32 1.1754944e-38, %v829_v47  ;;  %v789_v0 = vmul.f32 %v1886_v17, %v1829_v3  ;;  %v842_v25 = vand.u32 2147483647, %v1881_v13  ;;  %vm825_vm5 = vmor %vm823_vm9, %vm824_vm0 }
 0x1da   : > { %v496_v55 = vadd.f32 %v1227_v19, %v495_v46  ;;  %v510_v61 = vmul.f32 %v1231_v54, %v509_v48  ;;  %v844_v1 = vand.u32 2147483648, %v1881_v13  ;;  %vm793_vm3 = vweird.f32 %v1829_v3  ;;  %vm514_vm7 = vmor %vm512_vm13, %vm513_vm1 }
 0x1db   : > { %v822_v57 = vadd.f32 %v1857_v63, %v821_v29  ;;  %v790_v44 = vsub.f32 1.0, %v789_v0  ;;  %vm794_vm4 = vweird.f32 %v1886_v17  ;;  %vm838_vm6 = vweird.f32 %v1881_v13  ;;  %v1262_v0 = vld [vmem:[%s1484_s19 + $0x48] sm:$0xff] }
 0x1dc   : > { %v500_v7 = vsel %vm499_vm2, %v1227_v19, %v496_v55  ;;  %v511_v51 = vadd.f32 %v1231_v54, %v510_v61  ;;  %v799_v10 = vand.u32 2147483648, %v1829_v3  ;;  %1234 = vrcp.f32 %v1884_v6  ;;  %vm795_vm9 = vmor %vm793_vm3, %vm794_vm4 }
 0x1dd   : > { %v1233_v52 = vpop.eup %1232  ;;  %v505_v35 = vsel %vm1899_vm11, %v504_v38, %v500_v7  ;;  %v826_v15 = vsel %vm825_vm5, %v1857_v63, %v822_v57  ;;  %v791_v28 = vmul.f32 %v1886_v17, %v790_v44  ;;  %v797_v56 = vand.u32 2147483647, %v1829_v3 }
 0x1de   : > { %v515_v20 = vsel %vm514_vm7, %v1231_v54, %v511_v51  ;;  %v556_v16 = vmul.f32 %v505_v35, %v1497_v2  ;;  %v831_v21 = vsel %vm1903_vm12, %v830_v53, %v826_v15  ;;  %v834_v62 = vmul.f32 %v1233_v52, %v1881_v13  ;;  %v741_v3 = vpop.permute.xlu1 %740  ;;  %v1261_v13 = vld [vmem:[%s1484_s19 + $0x58] sm:$0xff] }
 0x1df   : > { %v520_v30 = vsel %vm1910_vm15, %v519_v39, %v515_v20  ;;  %vm1949_vm8 = vcmp.eq.f32.partialorder %v842_v25, 8.507059e+37  ;;  %v910_v63 = vmul.f32 %v1515_v9, %v831_v21  ;;  %v792_v18 = vadd.f32 %v1886_v17, %v791_v28 }
 0x1e0   : > { %v557_v2 = vmul.f32 %v520_v30, %v1502_v4  ;;  %564 = vst [vmem:[%s1877_s26 + $0x40] sm:$0xff] %v556_v16  ;;  %v835_v33 = vsub.f32 1.0, %v834_v62  ;;  %v845_v23 = vor.u32 1.1754944e-38, %v844_v1  ;;  %v800_v47 = vor.u32 1.1754944e-38, %v799_v10 }
 0x1e1   : > { %918 = vst [vmem:[%s1877_s26 + $0x30] sm:$0xff] %v910_v63  ;;  %v796_v19 = vsel %vm795_vm9, %v1886_v17, %v792_v18  ;;  %vm798_vm10 = vcmp.eq.f32.partialorder %v797_v56, 8.507059e+37  ;;  %v398_v9 = vadd.f32 %v390_v14, %v1776_v32  ;;  %v399_v41 = vadd.f32 %v390_v14, %v1782_v24 }
 0x1e2   : > { %v1235_v26 = vpop.eup %1234  ;;  %565 = vst [vmem:[%s1877_s26 + $0x48] sm:$0xff] %v557_v2  ;;  %v836_v4 = vmul.f32 %v1233_v52, %v835_v33  ;;  %vm839_vm11 = vweird.f32 %v1233_v52  ;;  %v801_v5 = vsel %vm798_vm10, %v800_v47, %v796_v19  ;;  %v754_v27 = vadd.f32 %v746_v37, %v1785_v49 }
 0x1e3   : > { %v804_v59 = vmul.f32 %v1235_v26, %v1884_v6  ;;  %v812_v31 = vand.u32 2147483647, %v1884_v6  ;;  %v814_v17 = vand.u32 2147483648, %v1884_v6  ;;  %v908_v54 = vmul.f32 %v1260_v60, %v801_v5  ;;  %vm840_vm12 = vmor %vm838_vm6, %vm839_vm11 }
 0x1e4   : > { %v837_v32 = vadd.f32 %v1233_v52, %v836_v4  ;;  %v1070_v22 = vmul.f32 -1.442695, %v398_v9  ;;  %v1071_v24 = vmul.f32 -1.442695, %v399_v41  ;;  %v755_v36 = vadd.f32 %v746_v37, %v1789_v8 }
 0x1e5   : > { %v805_v38 = vsub.f32 1.0, %v804_v59  ;;  %916 = vst [vmem:[%s1877_s26 + $0x10] sm:$0xff] %v908_v54  ;;  %v1098_v49 = vmul.f32 -1.442695, %v754_v27  ;;  %v752_v58 = vadd.f32 %v741_v3, %v1793_v11  ;;  %v753_v40 = vadd.f32 %v741_v3, %v1799_v12 }
 0x1e6   : > { %v841_v42 = vsel %vm840_vm12, %v1233_v52, %v837_v32  ;;  %vm809_vm13 = vweird.f32 %v1235_v26  ;;  %1236 = vpow2.f32 %v1070_v22  ;;  %v1099_v43 = vmul.f32 -1.442695, %v755_v36 }
 0x1e7   : > { %v846_v45 = vsel %vm1949_vm8, %v845_v23, %v841_v42  ;;  %v806_v34 = vmul.f32 %v1235_v26, %v805_v38  ;;  %1238 = vpow2.f32 %v1071_v24  ;;  %v1096_v8 = vmul.f32 -1.442695, %v752_v58 }
 0x1e8   : > { %v911_v46 = vmul.f32 %v1261_v13, %v846_v45  ;;  %1240 = vpow2.f32 %v1098_v49  ;;  %v1097_v48 = vmul.f32 -1.442695, %v753_v40  ;;  %vm808_vm14 = vweird.f32 %v1884_v6 }
 0x1e9   : > { %v807_v39 = vadd.f32 %v1235_v26, %v806_v34  ;;  %1242 = vpow2.f32 %v1099_v43  ;;  %vm810_vm15 = vmor %vm808_vm14, %vm809_vm13  ;;  %v815_v11 = vor.u32 1.1754944e-38, %v814_v17  ;;  %vm813_vm0 = vcmp.eq.f32.partialorder %v812_v31, 8.507059e+37 }
 0x1ea   : > { %919 = vst [vmem:[%s1877_s26 + $0x38] sm:$0xff] %v911_v46  ;;  %1244 = vpow2.f32 %v1096_v8 }
 0x1eb   : > { %v811_v12 = vsel %vm810_vm15, %v1235_v26, %v807_v39  ;;  %1246 = vpow2.f32 %v1097_v48  ;;  %v1263_v48 = vld [vmem:[%s1484_s19 + $0x30] sm:$0xff] }
 0x1ec   : > { %v1237_v14 = vpop.eup %1236  ;;  %v816_v29 = vsel %vm813_vm0, %v815_v11, %v811_v12 }
 0x1ed   : > { %v1239_v53 = vpop.eup %1238  ;;  %v909_v55 = vmul.f32 %v1262_v0, %v816_v29  ;;  %v430_v61 = vadd.f32 1.0, %v1237_v14  ;;  %v1264_v14 = vld [vmem:[%s1484_s19 + $0x38] sm:$0xff] }
 0x1ee   : > { %v1241_v25 = vpop.eup %1240  ;;  %v1984_v1 = vadd.f32 1.0, %v1239_v53 }
 0x1ef   : > { %v1243_v6 = vpop.eup %1242  ;;  %917 = vst [vmem:[%s1877_s26 + $0x18] sm:$0xff] %v909_v55  ;;  %1248 = vrcp.f32 %v430_v61  ;;  %v1988_v7 = vadd.f32 1.0, %v1241_v25  ;;  %v531_v52 = vand.u32 2147483647, %v430_v61  ;;  %v533_v35 = vand.u32 2147483648, %v430_v61 }
 0x1f0   : > { %v1245_v57 = vpop.eup %1244  ;;  %1250 = vrcp.f32 %v1984_v1  ;;  %v1990_v51 = vadd.f32 1.0, %v1243_v6  ;;  %v546_v15 = vand.u32 2147483647, %v1984_v1  ;;  %v548_v28 = vand.u32 2147483648, %v1984_v1 }
 0x1f1   : > { %v1247_v44 = vpop.eup %1246  ;;  %v1992_v10 = vadd.f32 1.0, %v1245_v57  ;;  %1252 = vrcp.f32 %v1988_v7  ;;  %vm527_vm1 = vweird.f32 %v430_v61  ;;  %v889_v16 = vand.u32 2147483648, %v1988_v7 }
 0x1f2   : > { %1254 = vrcp.f32 %v1990_v51  ;;  %v1998_v56 = vadd.f32 1.0, %v1247_v44  ;;  %vm542_vm2 = vweird.f32 %v1984_v1  ;;  %v887_v30 = vand.u32 2147483647, %v1988_v7 }
 0x1f3   : > { %1256 = vrcp.f32 %v1992_v10  ;;  %v904_v50 = vand.u32 2147483648, %v1990_v51  ;;  %vm2005_vm3 = vcmp.eq.f32.partialorder %v531_v52, 8.507059e+37  ;;  %v534_v18 = vor.u32 1.1754944e-38, %v533_v35  ;;  %v1265_v52 = vld [vmem:[%s1484_s19 + $0x70] sm:$0xff] }
 0x1f4   : > { %v902_v2 = vand.u32 2147483647, %v1990_v51  ;;  %vm2011_vm4 = vcmp.eq.f32.partialorder %v546_v15, 8.507059e+37  ;;  %v549_v47 = vor.u32 1.1754944e-38, %v548_v28  ;;  %1258 = vrcp.f32 %v1998_v56  ;;  %v1266_v28 = vld [vmem:[%s1484_s19 + $0x78] sm:$0xff] }
 0x1f5   : > { %v1249_v20 = vpop.eup %1248  ;;  %vm883_vm5 = vweird.f32 %v1988_v7  ;;  %v890_v41 = vor.u32 1.1754944e-38, %v889_v16  ;;  %vm898_vm6 = vweird.f32 %v1990_v51  ;;  %vm2019_vm8 = vcmp.eq.f32.partialorder %v887_v30, 8.507059e+37 }
 0x1f6   : > { %v1251_v21 = vpop.eup %1250  ;;  %v523_v62 = vmul.f32 %v1249_v20, %v430_v61  ;;  %vm528_vm7 = vweird.f32 %v1249_v20  ;;  %v905_v3 = vor.u32 1.1754944e-38, %v904_v50  ;;  %vm853_vm9 = vweird.f32 %v1992_v10 }
 0x1f7   : > { %v538_v37 = vmul.f32 %v1251_v21, %v1984_v1  ;;  %v1253_v19 = vpop.eup %1252  ;;  %vm543_vm10 = vweird.f32 %v1251_v21  ;;  %vm2025_vm11 = vcmp.eq.f32.partialorder %v902_v2, 8.507059e+37  ;;  %v857_v54 = vand.u32 2147483647, %v1992_v10  ;;  %vm529_vm12 = vmor %vm527_vm1, %vm528_vm7 }
 0x1f8   : > { %v524_v33 = vsub.f32 1.0, %v523_v62  ;;  %v1255_v26 = vpop.eup %1254  ;;  %v879_v5 = vmul.f32 %v1253_v19, %v1988_v7  ;;  %v859_v36 = vand.u32 2147483648, %v1992_v10  ;;  %vm884_vm13 = vweird.f32 %v1253_v19  ;;  %vm544_vm15 = vmor %vm542_vm2, %vm543_vm10  ;;  %v1267_v62 = vld [vmem:[%s1484_s19 + $0x60] sm:$0xff] }
 0x1f9   : > { %v539_v9 = vsub.f32 1.0, %v538_v37  ;;  %v1257_v59 = vpop.eup %1256  ;;  %v894_v17 = vmul.f32 %v1255_v26, %v1990_v51  ;;  %vm899_vm14 = vweird.f32 %v1255_v26  ;;  %vm885_vm1 = vmor %vm883_vm5, %vm884_vm13  ;;  %v872_v55 = vand.u32 2147483647, %v1998_v56 }
 0x1fa   : > { %v525_v4 = vmul.f32 %v1249_v20, %v524_v33  ;;  %v880_v22 = vsub.f32 1.0, %v879_v5  ;;  %v849_v24 = vmul.f32 %v1257_v59, %v1992_v10  ;;  %v1259_v58 = vpop.eup %1258  ;;  %vm854_vm0 = vweird.f32 %v1257_v59  ;;  %vm900_vm2 = vmor %vm898_vm6, %vm899_vm14 }
 0x1fb   : > { %v540_v31 = vmul.f32 %v1251_v21, %v539_v9  ;;  %v895_v49 = vsub.f32 1.0, %v894_v17  ;;  %v864_v13 = vmul.f32 %v1259_v58, %v1998_v56  ;;  %v860_v1 = vor.u32 1.1754944e-38, %v859_v36 }
 0x1fc   : > { %v526_v32 = vadd.f32 %v1249_v20, %v525_v4  ;;  %v881_v42 = vmul.f32 %v1253_v19, %v880_v22  ;;  %v850_v43 = vsub.f32 1.0, %v849_v24  ;;  %v874_v6 = vand.u32 2147483648, %v1998_v56 }
 0x1fd   : > { %v541_v38 = vadd.f32 %v1251_v21, %v540_v31  ;;  %v896_v8 = vmul.f32 %v1255_v26, %v895_v49  ;;  %v865_v0 = vsub.f32 1.0, %v864_v13  ;;  %vm858_vm5 = vcmp.eq.f32.partialorder %v857_v54, 8.507059e+37 }
 0x1fe   : > { %v530_v40 = vsel %vm529_vm12, %v1249_v20, %v526_v32  ;;  %v882_v11 = vadd.f32 %v1253_v19, %v881_v42  ;;  %v851_v12 = vmul.f32 %v1257_v59, %v850_v43  ;;  %vm868_vm6 = vweird.f32 %v1998_v56 }
 0x1ff   : > { %v535_v45 = vsel %vm2005_vm3, %v534_v18, %v530_v40  ;;  %v545_v34 = vsel %vm544_vm15, %v1251_v21, %v541_v38  ;;  %v897_v53 = vadd.f32 %v1255_v26, %v896_v8  ;;  %vm855_vm3 = vmor %vm853_vm9, %vm854_vm0  ;;  %v866_v7 = vmul.f32 %v1259_v58, %v865_v0  ;;  %v1268_v18 = vld [vmem:[%s1484_s19 + $0x68] sm:$0xff] }
 0x200   : > { %v550_v46 = vsel %vm2011_vm4, %v549_v47, %v545_v34  ;;  %v558_v39 = vmul.f32 %v1263_v48, %v535_v45  ;;  %v886_v61 = vsel %vm885_vm1, %v1253_v19, %v882_v11  ;;  %v852_v25 = vadd.f32 %v1257_v59, %v851_v12 }
 0x201   : > { %v559_v29 = vmul.f32 %v1264_v14, %v550_v46  ;;  %v891_v57 = vsel %vm2019_vm8, %v890_v41, %v886_v61  ;;  %v901_v44 = vsel %vm900_vm2, %v1255_v26, %v897_v53  ;;  %vm869_vm4 = vweird.f32 %v1259_v58 }
 0x202   : > { %566 = vst [vmem:[%s1877_s26 + $0x60] sm:$0xff] %v558_v39  ;;  %v906_v51 = vsel %vm2025_vm11, %v905_v3, %v901_v44  ;;  %v914_v35 = vmul.f32 %v1265_v52, %v891_v57  ;;  %v856_v15 = vsel %vm855_vm3, %v1257_v59, %v852_v25  ;;  %v867_v21 = vadd.f32 %v1259_v58, %v866_v7  ;;  %vm870_vm7 = vmor %vm868_vm6, %vm869_vm4 }
 0x203   : > { %567 = vst [vmem:[%s1877_s26 + $0x68] sm:$0xff] %v559_v29  ;;  %v915_v20 = vmul.f32 %v1266_v28, %v906_v51  ;;  %v861_v16 = vsel %vm858_vm5, %v860_v1, %v856_v15  ;;  %v875_v10 = vor.u32 1.1754944e-38, %v874_v6  ;;  %vm873_vm8 = vcmp.eq.f32.partialorder %v872_v55, 8.507059e+37 }
 0x204   : > { %922 = vst [vmem:[%s1877_s26 + $0x70] sm:$0xff] %v914_v35  ;;  %v912_v30 = vmul.f32 %v1267_v62, %v861_v16  ;;  %v871_v50 = vsel %vm870_vm7, %v1259_v58, %v867_v21 }
 0x205   : > { %923 = vst [vmem:[%s1877_s26 + $0x78] sm:$0xff] %v915_v20  ;;  %v876_v63 = vsel %vm873_vm8, %v875_v10, %v871_v50 }
 0x206   : > { %920 = vst [vmem:[%s1877_s26 + $0x50] sm:$0xff] %v912_v30  ;;  %v913_v37 = vmul.f32 %v1268_v18, %v876_v63 }
 0x208   : > { %921 = vst [vmem:[%s1877_s26 + $0x58] sm:$0xff] %v913_v37 }
 0x209   : > { %1326 = shalt.err (!%p1323_p13)
}
 0x20a   : > { %s1387_s15 = smov 512   ;;  %s1388_s19 = smov 32  }
 0x20b   : > { %1109 = dma.vmem_to_hbm [thread:$0]  (%p1455_p9), %s941_s29, 2048, %s943_s30, %s925_s3, %s1387_s15, %s1387_s15, %s1388_s19  }
 0x20c PF: > { %s957_s21 = sand.u32 1, %s1361_s9   ;;  %p1116_p0 = pnand %p1049_p12, %p1462_p11 }
 0x20d   : > { %s958_s25 = scalar_lea.sflag [#allocation4], %s957_s21 }
 0x20e   : > { %p1117_p1 = pneg %p1116_p0 }
 0x210   : > { %1356 = dma.done.wait (%p1117_p1), %s958_s25, 2048  }
 0x211   : > { %1358 = vsyncadd (%p1117_p1), %s958_s25, 4294965248  ;;  %s18_s14 = sadd.s32 1, %s1381_s14   ;;  %s2147_s9 = smov %s1365_s10 }
 0x212   : > { %p15_p2 = scmp.ge.s32.totalorder %s18_s14, 4   ;;  %s2148_s10 = smov %s1369_s11 }
 0x213   : > { %s2149_s11 = smov %s1460_s23  ;;  %s2150_s12 = smov %s1377_s13 }
 0x214   : > { %s2151_s13 = smov %s2153_s17  ;;  %17 = sbr.rel (!%p15_p2) target bundleno = 6 (0x6), region = 82 }
 0x219   :  { %964 = vsyncpa [#allocation3], 1 }
 0x21a   :  { %966 = vsyncpa [#allocation3 + $0x1], 1 }
 0x21b   :  { %967 = vsyncpa [#allocation4], 1 }
 0x21c   :  { %969 = vsyncpa [#allocation4 + $0x1], 1 }

</bundles_post_ra>
